<compile_context>
chip_gen: v6e
topology: v6e:2x2x1
jax: 0.10.0
libtpu: 0.0.40
codegen_flags: <defaults>
</compile_context>

<pallas_src>
import math
import numpy as np
import jax
import jax.numpy as jnp
from jax.experimental import pallas as pl
from jax.experimental.pallas import tpu as pltpu


def _round_up(x, m):
    return ((x + m - 1) // m) * m


def _adaptive_pool_matrix(out_size, in_size):
    """Row-stochastic matrix reproducing nn.AdaptiveAvgPool2d bin semantics."""
    m = np.zeros((out_size, in_size), np.float32)
    for i in range(out_size):
        start = (i * in_size) // out_size
        end = ((i + 1) * in_size + out_size - 1) // out_size  # ceil
        m[i, start:end] = 1.0 / (end - start)
    return jnp.asarray(m)


def _bilinear_matrix(out_size, in_size):
    """Interp matrix matching F.interpolate(mode='bilinear', align_corners=False)."""
    m = np.zeros((out_size, in_size), np.float32)
    scale = in_size / out_size
    for j in range(out_size):
        src = (j + 0.5) * scale - 0.5
        src = min(max(src, 0.0), float(in_size - 1))
        i0 = int(np.floor(src))
        i1 = min(i0 + 1, in_size - 1)
        w1 = src - i0
        m[j, i0] += 1.0 - w1
        m[j, i1] += w1
    return jnp.asarray(m)


def _psp_fused_kernel(yw_ref, b_ref, wf_ref, xf_ref, bias_ref, o_ref):
    # Pyramid branch (upsample folded into the bottleneck weight):
    #   (tn, s_pad) @ (s_pad, tm) -> (tn, tm)
    acc = jnp.dot(yw_ref[...], b_ref[...], preferred_element_type=jnp.float32)
    # Identity (feats) branch; the f32 feats tile is cast to bf16 here (VPU work that
    # overlaps the MXU), avoiding a separate wrapper-side cast pass over HBM.
    xf = xf_ref[...].astype(wf_ref.dtype)
    acc += jnp.dot(wf_ref[...], xf, preferred_element_type=jnp.float32)
    # Bias + ReLU in f32 (safe on v5e which has no bf16 VPU path).
    acc += bias_ref[...]                      # (tn, 1) broadcast across lanes
    o_ref[...] = jnp.maximum(acc, 0.0).astype(o_ref.dtype)


def psp_module_forward(feats, params, sizes=(1, 2, 3, 6), tile_m=1024,
                       compute_dtype=jnp.bfloat16, out_dtype=jnp.bfloat16,
                       vmem_budget_bytes=40 * 1024 * 1024):
    N, C, H, W = feats.shape
    HW = H * W
    n_sizes = len(sizes)
    Fout = params["bottleneck_b"].shape[0]
    wb = params["bottleneck_w"].reshape(Fout, (n_sizes + 1) * C)

    # ---- JAX glue: adaptive avg pooling (one feats pass for all stages) + tiny
    # ---- stage 1x1 convs (<= 36 px each), folded into the bottleneck weight (YW).
    pw_cat = jnp.concatenate([_adaptive_pool_matrix(s, W) for s in sizes], axis=0)
    tw = jnp.einsum('ncij,qj->nciq', feats, pw_cat)          # (N, C, H, sum(sizes))

    yw_list, b_list = [], []
    off = 0
    for idx, (s, ws) in enumerate(zip(sizes, params["stage_w"])):
        Ph = _adaptive_pool_matrix(s, H)
        pooled = jnp.einsum('pi,nciq->ncpq', Ph, tw[..., off:off + s])  # (N, C, s, s)
        off += s
        y = jnp.einsum('oc,ncpq->nopq', ws, pooled)                     # stage conv, no bias
        y_rows = jnp.transpose(y, (0, 2, 3, 1)).reshape(N, s * s, C)    # (N, s*s, C)
        w_stage = wb[:, idx * C:(idx + 1) * C]                          # (Fout, C)
        yw_list.append(jnp.einsum('npc,fc->nfp', y_rows, w_stage))      # (N, Fout, s*s)
        Uh = _bilinear_matrix(H, s)
        Uw = _bilinear_matrix(W, s)
        # Uh ⊗ Uw kept dense: negligible after the YW fusion.
        b_list.append(jnp.einsum('hi,wj->hwij', Uh, Uw).reshape(HW, s * s))

    yw = jnp.concatenate(yw_list, axis=2)                 # (N, Fout, s_total)
    b_all = jnp.concatenate(b_list, axis=1).T             # (s_total, HW)
    s_total = b_all.shape[0]

    wf = wb[:, n_sizes * C:]                              # (Fout, C), native layout
    bias = params["bottleneck_b"].reshape(Fout, 1)

    # ---- tile / layout selection ----
    s_pad = _round_up(s_total, 64)        # clean bf16 sublane packing (50 -> 64)

    n_spatial = max(1, math.ceil(HW / tile_m))
    if N == 1 and HW >= 256:
        n_spatial = max(n_spatial, 2)     # keep both v7x TensorCores busy
    tm = _round_up(math.ceil(HW / n_spatial), 128)        # lane-dense, unmasked stores

    Foutp = _round_up(Fout, 16)
    tn = Foutp                                            # default: no Fout tiling
    feats_bpe = feats.dtype.itemsize
    out_bpe = np.dtype(out_dtype).itemsize

    def _vmem_needed(tm_, tn_):
        # double-buffered pipeline blocks + f32 accumulator scratch
        in_b = (tn_ * s_pad + s_pad * tm_ + tn_ * C) * 2 + C * tm_ * feats_bpe + tn_ * 4
        out_b = tn_ * tm_ * out_bpe
        return 2 * (in_b + out_b) + 2 * tn_ * tm_ * 4

    while _vmem_needed(tm, tn) > vmem_budget_bytes and tm > 256:
        tm -= 128
    if _vmem_needed(tm, tn) > vmem_budget_bytes and Fout > 128:
        # Very large C*Fout: tile Fout, keeping f the innermost grid axis so the big
        # feats tile stays resident across f-steps (only the small weights re-fetch).
        Foutp = _round_up(Fout, 128)
        tn = 128

    HWp = _round_up(HW, tm)

    # ---- padding (padded regions are zero / sliced off; numerically inert) ----
    if Foutp != Fout:
        yw = jnp.pad(yw, ((0, 0), (0, Foutp - Fout), (0, 0)))
        wf = jnp.pad(wf, ((0, Foutp - Fout), (0, 0)))
        bias = jnp.pad(bias, ((0, Foutp - Fout), (0, 0)))
    if s_pad != s_total:
        yw = jnp.pad(yw, ((0, 0), (0, 0), (0, s_pad - s_total)))
        b_all = jnp.pad(b_all, ((0, s_pad - s_total), (0, 0)))

    xf = feats.reshape(N, C, HW)          # free view of NCHW; bf16 cast happens in-kernel
    if HWp != HW:
        xf = jnp.pad(xf, ((0, 0), (0, 0), (0, HWp - HW)))
        b_all = jnp.pad(b_all, ((0, 0), (0, HWp - HW)))

    # Small operands -> bf16 (halves their HBM traffic); accumulation stays f32.
    yw = yw.astype(compute_dtype)
    b_all = b_all.astype(compute_dtype)
    wf = wf.astype(compute_dtype)
    bias = bias.astype(jnp.float32)

    vmem_limit = int(min(50 * 1024 * 1024,
                         max(24 * 1024 * 1024,
                             _vmem_needed(tm, tn) + 8 * 1024 * 1024)))

    # Spatial axis leading (megacore splits HW rather than a tiny batch axis); the
    # Fout axis (usually a single step) is innermost so feats never re-streams.
    grid = (HWp // tm, N, Foutp // tn)

    out = pl.pallas_call(
        _psp_fused_kernel,
        out_shape=jax.ShapeDtypeStruct((N, Foutp, HWp), out_dtype),
        grid=grid,
        in_specs=[
            pl.BlockSpec((None, tn, s_pad), lambda j, n, f: (n, f, 0)),  # fused pyramid weight
            pl.BlockSpec((s_pad, tm),       lambda j, n, f: (0, j)),     # bilinear rows
            pl.BlockSpec((tn, C),           lambda j, n, f: (f, 0)),     # feats-branch weight
            pl.BlockSpec((None, C, tm),     lambda j, n, f: (n, 0, j)),  # feats tile (f32)
            pl.BlockSpec((tn, 1),           lambda j, n, f: (f, 0)),     # bias
        ],
        out_specs=pl.BlockSpec((None, tn, tm), lambda j, n, f: (n, f, j)),
        compiler_params=pltpu.CompilerParams(
            dimension_semantics=("parallel", "parallel", "parallel"),
            vmem_limit_bytes=vmem_limit,
        ),
    )(yw, b_all, wf, xf, bias)

    # Output is already channel-major: slice padding off and reshape straight to NCHW.
    return out[:, :Fout, :HW].reshape(N, Fout, H, W)


def psp_reference(feats, params, sizes=(1, 2, 3, 6)):
    """Pure-JAX reference mirroring the PyTorch forward (for a correctness check)."""
    N, C, H, W = feats.shape
    priors = []
    for s, ws in zip(sizes, params["stage_w"]):
        Ph = _adaptive_pool_matrix(s, H)
        Pw = _adaptive_pool_matrix(s, W)
        pooled = jnp.einsum('pi,ncij,qj->ncpq', Ph, feats, Pw)
        y = jnp.einsum('oc,ncpq->nopq', ws, pooled)
        Uh = _bilinear_matrix(H, s)
        Uw = _bilinear_matrix(W, s)
        priors.append(jnp.einsum('hp,ncpq,wq->nchw', Uh, y, Uw))
    cat = jnp.concatenate(priors + [feats], axis=1)
    Fout = params["bottleneck_b"].shape[0]
    wbm = params["bottleneck_w"].reshape(Fout, -1)
    out = jnp.einsum('fk,nkhw->nfhw', wbm, cat) + params["bottleneck_b"][None, :, None, None]
    return jnp.maximum(out, 0.0)


if __name__ == "__main__":
    key = jax.random.PRNGKey(0)
    N, C, H, W = 2, 4, 16, 16          # small shapes; features=C
    Fout = 32                          # scaled-down out_features
    sizes = (1, 2, 3, 6)

    k_x, k_s, k_w, k_b = jax.random.split(key, 4)
    feats = jax.random.normal(k_x, (N, C, H, W), jnp.float32)
    stage_keys = jax.random.split(k_s, len(sizes))
    params = {
        # stage 1x1 convs: (C_out, C_in), no bias
        "stage_w": [0.2 * jax.random.normal(sk, (C, C), jnp.float32) for sk in stage_keys],
        # bottleneck 1x1 conv: (F_out, 5*C) weight + (F_out,) bias
        "bottleneck_w": 0.1 * jax.random.normal(k_w, (Fout, C * (len(sizes) + 1)), jnp.float32),
        "bottleneck_b": 0.05 * jax.random.normal(k_b, (Fout,), jnp.float32),
    }

    out = psp_module_forward(feats, params, sizes=sizes)
    out = jax.block_until_ready(out)

    ref = psp_reference(feats, params, sizes=sizes)
    assert out.shape == (N, Fout, H, W), out.shape
    # bf16 operands / bf16 output with f32 accumulation: tolerance set for bf16 rounding.
    err = float(jnp.max(jnp.abs(out.astype(jnp.float32) - ref)))
    assert err < 5e-2, err
    print("KERNEL_OK")
</pallas_src>

<mosaic_0001>
module attributes {stable_mosaic.version = 11 : i64} {
  func.func @_psp_fused_kernel(%arg0: i32, %arg1: i32, %arg2: i32, %arg3: memref<1x32x64xbf16, #tpu.memory_space<vmem>>, %arg4: memref<64x256xbf16, #tpu.memory_space<vmem>>, %arg5: memref<32x4xbf16, #tpu.memory_space<vmem>>, %arg6: memref<1x4x256xf32, #tpu.memory_space<vmem>>, %arg7: memref<32x1xf32, #tpu.memory_space<vmem>>, %arg8: memref<1x32x256xbf16, #tpu.memory_space<vmem>>) attributes {dimension_semantics = [#tpu.dimension_semantics<parallel>, #tpu.dimension_semantics<parallel>, #tpu.dimension_semantics<parallel>], iteration_bounds = array<i64: 1, 2, 1>, scalar_prefetch = 0 : i64, scratch_operands = 0 : i64, tpu.core_type = #tpu.core_type<tc>, window_params = [{transform_indices = @transform_0, window_bounds = array<i64: 1, 32, 64>}, {transform_indices = @transform_1, window_bounds = array<i64: 64, 256>}, {transform_indices = @transform_2, window_bounds = array<i64: 32, 4>}, {transform_indices = @transform_3, window_bounds = array<i64: 1, 4, 256>}, {transform_indices = @transform_4, window_bounds = array<i64: 32, 1>}, {transform_indices = @transform_5, window_bounds = array<i64: 1, 32, 256>}]} {
    %c0 = arith.constant 0 : index
    %c0_0 = arith.constant 0 : index
    %c0_1 = arith.constant 0 : index
    %0 = vector.load %arg3[%c0, %c0_0, %c0_1] : memref<1x32x64xbf16, #tpu.memory_space<vmem>>, vector<1x32x64xbf16>
    %1 = vector.shape_cast %0 : vector<1x32x64xbf16> to vector<32x64xbf16>
    %c0_2 = arith.constant 0 : index
    %c0_3 = arith.constant 0 : index
    %2 = vector.load %arg4[%c0_2, %c0_3] : memref<64x256xbf16, #tpu.memory_space<vmem>>, vector<64x256xbf16>
    %cst = arith.constant dense<0.000000e+00> : vector<32x256xf32>
    %3 = tpu.matmul %1, %2, %cst {dimension_numbers = #tpu.dot_dimension_numbers<[1], [0], [0], [1], [0, 0, 1, 1], [], []>} : vector<32x64xbf16>, vector<64x256xbf16>, vector<32x256xf32> -> vector<32x256xf32>
    %c0_4 = arith.constant 0 : index
    %c0_5 = arith.constant 0 : index
    %c0_6 = arith.constant 0 : index
    %4 = vector.load %arg6[%c0_4, %c0_5, %c0_6] : memref<1x4x256xf32, #tpu.memory_space<vmem>>, vector<1x4x256xf32>
    %5 = vector.shape_cast %4 : vector<1x4x256xf32> to vector<4x256xf32>
    %6 = arith.truncf %5 : vector<4x256xf32> to vector<4x256xbf16>
    %c0_7 = arith.constant 0 : index
    %c0_8 = arith.constant 0 : index
    %7 = vector.load %arg5[%c0_7, %c0_8] : memref<32x4xbf16, #tpu.memory_space<vmem>>, vector<32x4xbf16>
    %cst_9 = arith.constant dense<0.000000e+00> : vector<32x256xf32>
    %8 = tpu.matmul %7, %6, %cst_9 {dimension_numbers = #tpu.dot_dimension_numbers<[1], [0], [0], [1], [0, 0, 1, 1], [], []>} : vector<32x4xbf16>, vector<4x256xbf16>, vector<32x256xf32> -> vector<32x256xf32>
    %9 = arith.addf %3, %8 : vector<32x256xf32>
    %c0_10 = arith.constant 0 : index
    %c0_11 = arith.constant 0 : index
    %10 = vector.load %arg7[%c0_10, %c0_11] : memref<32x1xf32, #tpu.memory_space<vmem>>, vector<32x1xf32>
    %11 = vector.broadcast %10 : vector<32x1xf32> to vector<32x256xf32>
    %12 = arith.addf %9, %11 : vector<32x256xf32>
    %cst_12 = arith.constant 0.000000e+00 : f32
    %13 = vector.broadcast %cst_12 : f32 to vector<32x256xf32>
    %14 = arith.maximumf %12, %13 : vector<32x256xf32>
    %15 = arith.truncf %14 : vector<32x256xf32> to vector<32x256xbf16>
    %c0_13 = arith.constant 0 : index
    %c0_14 = arith.constant 0 : index
    %c0_15 = arith.constant 0 : index
    %16 = vector.load %arg8[%c0_13, %c0_14, %c0_15] : memref<1x32x256xbf16, #tpu.memory_space<vmem>>, vector<1x32x256xbf16>
    %17 = vector.shape_cast %16 : vector<1x32x256xbf16> to vector<32x256xbf16>
    %18 = vector.shape_cast %15 : vector<32x256xbf16> to vector<1x32x256xbf16>
    tpu.vector_store %arg8[%c0_13, %c0_14, %c0_15], %18 {strides = array<i32>} : memref<1x32x256xbf16, #tpu.memory_space<vmem>>, vector<1x32x256xbf16>,
    return
  }
  func.func @transform_0(%arg0: i32, %arg1: i32, %arg2: i32) -> (i32, i32, i32) {
    %c0_i32 = arith.constant 0 : i32
    %c0_i32_0 = arith.constant 0 : i32
    return %arg1, %arg2, %c0_i32 : i32, i32, i32
  }
  func.func @transform_1(%arg0: i32, %arg1: i32, %arg2: i32) -> (i32, i32) {
    %c0_i32 = arith.constant 0 : i32
    %c0_i32_0 = arith.constant 0 : i32
    return %c0_i32, %arg0 : i32, i32
  }
  func.func @transform_2(%arg0: i32, %arg1: i32, %arg2: i32) -> (i32, i32) {
    %c0_i32 = arith.constant 0 : i32
    %c0_i32_0 = arith.constant 0 : i32
    return %arg2, %c0_i32 : i32, i32
  }
  func.func @transform_3(%arg0: i32, %arg1: i32, %arg2: i32) -> (i32, i32, i32) {
    %c0_i32 = arith.constant 0 : i32
    %c0_i32_0 = arith.constant 0 : i32
    return %arg1, %c0_i32, %arg0 : i32, i32, i32
  }
  func.func @transform_4(%arg0: i32, %arg1: i32, %arg2: i32) -> (i32, i32) {
    %c0_i32 = arith.constant 0 : i32
    %c0_i32_0 = arith.constant 0 : i32
    return %arg2, %c0_i32 : i32, i32
  }
  func.func @transform_5(%arg0: i32, %arg1: i32, %arg2: i32) -> (i32, i32, i32) {
    %c0_i32 = arith.constant 0 : i32
    return %arg1, %arg2, %arg0 : i32, i32, i32
  }
}

</mosaic_0001>

<bundles_post_ra>
// kernel: tpu_custom_call.1
= control target key start
LH: loop header
LB: loop body
LE: loop exit
PB: predicated region body
PF: predicated region fallthrough
CT: control target
= control target key end

     0   :  { %10 = vsyncpa [#allocation3], 0  ;;  %s1267_s0 = inlined_call_operand.vmem [shape: bf16[2,32,64], index: 0, kind: input, shape index: {}]   ;;  %s1268_s1 = inlined_call_operand.hbm [shape: bf16[64,256], index: 1, kind: input, shape index: {}]   ;;  %s1269_s2 = inlined_call_operand.vmem [shape: bf16[32,4], index: 2, kind: input, shape index: {}]   ;;  %s1270_s3 = inlined_call_operand.vmem [shape: f32[2,4,256], index: 3, kind: input, shape index: {}]   ;;  %s1271_s4 = inlined_call_operand.vmem [shape: f32[32,1], index: 4, kind: input, shape index: {}]   ;;  %s1272_s5 = inlined_call_operand.hbm [shape: bf16[2,32,256], index: 5, kind: output, shape index: {}]  }
   0x1   :  { %11 = vsyncpa [#allocation4], 0 }
   0x2   :  { %13 = vsyncpa [#allocation4 + $0x1], 0  ;;  %s1101_s18 = smov 0   ;;  %s1103_s19 = smov 0  }
   0x3   :  { %s1105_s20 = smov 0   ;;  %s1107_s21 = smov 0  }
   0x4   :  { %s1109_s22 = smov 0   ;;  %s1111_s23 = smov 0  }
   0x5 LB: > { %s811_s24 = sadd.s32 4294967295, %s1062_s23   ;;  %s812_s25 = sadd.s32 4294967294, %s1062_s23   ;;  %s1062_s23 = sphi %s1111_s23, %s19_s23   ;;  %s1058_s22 = sphi %s1109_s22, %s1281_s22   ;;  %s1054_s21 = sphi %s1107_s21, %s1280_s21   ;;  %s1050_s20 = sphi %s1105_s20, %s1279_s20   ;;  %s1046_s19 = sphi %s1103_s19, %s1278_s19   ;;  %s1042_s18 = sphi %s1101_s18, %s1277_s18  }
   0x6   : > { %s34_s26 = sadd.s32 1, %s1058_s22  ;;  %s183_s27 = sadd.s32 1, %s1050_s20 }
   0x7   : > { %p36_p0 = scmp.ge.s32.totalorder %s34_s26, 2  ;;  %p193_p1 = scmp.ne.s32.totalorder %s1050_s20, %s1046_s19 }
   0x8   : > { %p194_p2 = scmp.eq.s32.totalorder %s811_s24, 1  ;;  %p199_p3 = scmp.ne.s32.totalorder %s1046_s19, %s1042_s18 }
   0x9   : > { %s1283_s26 = smov (%p36_p0, %s34_s26), 0  ;;  %p200_p5 = scmp.eq.s32.totalorder %s812_s25, 1 }
   0xa   : > { %p1141_p4 = por %p194_p2, %p193_p1  ;;  %s176_s29 = ssub.s32 %s1058_s22, %s1283_s26 }
   0xb   : > { %p813_p6 = scmp.ge.s32.totalorder %s1062_s23, 1  ;;  %p181_p7 = scmp.eq.s32.totalorder %s176_s29, 0 }
   0xc   : > { %p1148_p8 = por %p200_p5, %p199_p3  ;;  %p207_p9 = scmp.lt.s32.totalorder %s1062_s23, 3 }
   0xd   : > { %s1154_s6 = scalar_select %p181_p7, %s1050_s20, %s183_s27  }
   0xe   : > { %p1156_p10 = pnand %p813_p6, %p207_p9  ;;  %p1160_p11 = scmp.eq.s32.totalorder %s811_s24, 0 }
   0xf   : > { %s1064_s9 = smov [#allocation2]  }
  0x10   : > { %p872_p12 = pneg %p1156_p10  ;;  %s222_s10 = sshll.u32 %s1064_s9, 4  ;;  %s223_s10 = int_to_ptr.vmem [resolvable:$true] %s222_s10 }
  0x11   : > { %s967_s11 = scalar_lea.vmem %s223_s10, 1024  ;;  %p975_p5 = scmp.lt.s32.totalorder %s223_s10, %s223_s10 }
  0x12   : > { %p873_p13 = pnand %p1160_p11, %p872_p12  ;;  %p968_p1 = scmp.ne.s32.totalorder %s223_s10, %s967_s11 }
  0x13   : > { %p976_p6 = scmp.lt.s32.totalorder %s967_s11, %s967_s11 }
  0x14   : > { %p958_p0 = pneg %p873_p13 }
  0x15   : > { %p977_p7 = por %p976_p6, %p975_p5 }
  0x16   : > { %p970_p2 = pnand %p968_p1, %p958_p0 }
  0x18   : > { %p971_p3 = pneg %p970_p2 }
  0x1a   : > { %p978_p9 = pnand %p977_p7, %p971_p3 }
  0x1c   : > { %981 = shalt.err (!%p978_p9)
}
  0x1d   : > { %s1065_s12 = smov 128   ;;  %s1066_s13 = smov 8  }
  0x1e   : > { %875 = dma.hbm_to_vmem [thread:$0]  (!%p873_p13), %s1268_s1, 1024, %s223_s10, [#allocation3], %s1065_s12, %s1065_s12, %s1066_s13  }
  0x1f   : > { %282 = sbr.rel (%p1156_p10) target bundleno = 289 (0x121), region = 40 }
  0x24   : > { %1033 = dma.done.wait (%p1160_p11), [#allocation3], 1024  }
  0x25   : > { %1035 = vsyncadd (%p1160_p11), [#allocation3], 4294966272  ;;  %p334_p12 = scmp.lt.s32.totalorder %s1054_s21, 1  ;;  %v1067_v0 = vmov 0   ;;  %v939_v1 = vld [vmem:[#allocation2 + $0x34] ss:$8 sps:$4 sm:$0xff]  }
  0x26   : > { %447 = vmatprep.mubr.bf16.mxu0 %v1067_v0  ;;  %567 = vmatprep.mubr.bf16.mxu1 %v1067_v0  ;;  %v941_v2 = vld [vmem:[#allocation2 + $0x30] ss:$8 sps:$4 sm:$0xff]   ;;  %vm408_vm0 = vcmask 1041408   ;;  %v944_v6 = vld [vmem:[#allocation2 + $0x24] ss:$8 sps:$4 sm:$0xff]   ;;  %vm401_vm1 = vcmask 31744  }
  0x27   : > { %s335_s16 = scalar_select %p334_p12, %s1054_s21, 1  ;;  %938 = vset.pattern.permute.xlu1 %v1067_v0  ;;  %937 = vset.pattern.permute.xlu0 %v1067_v0  ;;  %v946_v7 = vld [vmem:[#allocation2 + $0x20] ss:$8 sps:$4 sm:$0xff]   ;;  %v948_v10 = vld [vmem:[#allocation2 + $0x14] ss:$8 sps:$4 sm:$0xff]   ;;  %vm518_vm2 = vcmask 523264  }
  0x28   : > { %858 = vmatprep.subr.bf16.mxu1 %v939_v1  ;;  %v947_v11 = vld [vmem:[%s1269_s2] sm:$0xff]   ;;  %v950_v12 = vld [vmem:[#allocation2 + $0x10] ss:$8 sps:$4 sm:$0xff]   ;;  %v954_v19 = vld [vmem:[%s1269_s2 + $0x8] sm:$0xff]   ;;  %s330_s7 = sand.u32 1, %s1046_s19   ;;  %s857_s11 = sshll.u32 %s1054_s21, 9 }
  0x29   : > { %s851_s17 = sshll.u32 %s335_s16, 4  ;;  %s852_s24 = sshll.u32 %s335_s16, 3  ;;  %862 = vmatpush1.bf16.msra.mxu1 %v941_v2  ;;  %v951_v13 = vld [vmem:[#allocation2 + $0x4] ss:$8 sps:$4 sm:$0xff]   ;;  %v580_v14 = vld [vmem:[%s1271_s4 + $0x10] sm:$0xff]  ;;  %v581_v16 = vld [vmem:[%s1271_s4 + $0x18] sm:$0xff] }
  0x2a   : > { %s358_s29 = scalar_lea.vmem %s1270_s3, %s852_s24  ;;  %s1185_s8 = scalar_lea.vmem %s1267_s0, %s851_s17  ;;  %859 = vmatprep.subr.bf16.mxu1 %v944_v6  ;;  %594 = vperm.xlu1 %938, %v580_v14   ;;  %v953_v15 = vld [vmem:[#allocation2] ss:$8 sps:$4 sm:$0xff]  }
  0x2b   : > { %v381_v3 = vld [vmem:[%s358_s29] sm:$0xff]  ;;  %v955_v18 = vld [vmem:[%s1185_s8 + $0x8] sm:$0xff]   ;;  %s820_s9 = sshll.u32 %s330_s7, 5  ;;  %s1218_s14 = scalar_lea.hbm %s1272_s5, %s857_s11 }
  0x2c   : > { %v383_v4 = vcombine.high %v381_v3, %v381_v3  ;;  %v385_v5 = vpack.c.bf16 %v381_v3, %v381_v3  ;;  %v578_v17 = vld [vmem:[%s1271_s4] sm:$0xff]  ;;  %v579_v20 = vld [vmem:[%s1271_s4 + $0x8] sm:$0xff]  ;;  %s1222_s15 = scalar_lea.sflag [#allocation4], %s330_s7  ;;  %s1068_s21 = smov [#allocation5]  }
  0x2d   : > { %863 = vmatpush1.bf16.msra.mxu1 %v946_v7  ;;  %584 = vperm.xlu0 %937, %v578_v17   ;;  %v943_v21 = vld [vmem:[%s1185_s8] sm:$0xff]   ;;  %s332_s8 = scalar_lea.vmem [#allocation5], %s820_s9  ;;  %s986_s17 = sshll.u32 %s1068_s21, 4  ;;  %s987_s17 = int_to_ptr.vmem [resolvable:$false] %s986_s17 }
  0x2e   : > { %v386_v8 = vpack.c.bf16 %v383_v4, %v383_v4  ;;  %v410_v9 = vsel %vm408_vm0, %v385_v5, 0  ;;  %860 = vmatprep.subr.bf16.mxu1 %v948_v10  ;;  %599 = vperm.xlu1 %938, %v581_v16   ;;  %s665_s10 = sshll.u32 %s332_s8, 4  ;;  %s988_s24 = scalar_lea.vmem %s987_s17, 1024  ;;  %s1213_s10 = int_to_ptr.vmem [resolvable:$true] %s665_s10 }
  0x2f   : > { %s982_s16 = scalar_lea.vmem %s1213_s10, 512  ;;  %p989_p0 = scmp.lt.s32.totalorder %s1213_s10, %s987_s17 }
  0x30   : > { %827 = vmatprep.subr.msk.bf16.mxu0 %vm408_vm0, %v386_v8  ;;  %p983_p10 = scmp.ne.s32.totalorder %s1213_s10, %s982_s16  ;;  %p990_p1 = scmp.lt.s32.totalorder %s988_s24, %s982_s16 }
  0x31   : > { %430 = vmatpush1.bf16.msra.mxu0 %v410_v9  ;;  %864 = vmatpush1.bf16.msra.mxu1 %v950_v12 }
  0x32   : > { %533 = vmatprep.subr.bf16.mxu0 %v939_v1  ;;  %861 = vmatprep.subr.bf16.mxu1 %v951_v13  ;;  %p984_p11 = pnand %p983_p10, %p1141_p4  ;;  %p991_p2 = por %p990_p1, %p989_p0 }
  0x33   : > { %589 = vperm.xlu0 %937, %v579_v20  }
  0x34   : > { %828 = vmatmul.mubr.msk.bf16.vlgmr.msra.gmra.mxu0 %vm401_vm1, %v947_v11  ;;  %p985_p13 = pneg %p984_p11 }
  0x35   : > { %534 = vmatpush1.bf16.msra.mxu0 %v941_v2  ;;  %457 = vmatprep.mubr.bf16.mxu0 %v1067_v0 }
  0x36   : > { %535 = vmatprep.subr.bf16.mxu0 %v944_v6  ;;  %865 = vmatpush1.bf16.msra.mxu1 %v953_v15  ;;  %p992_p3 = pnand %p991_p2, %p985_p13 }
  0x39   : > { %536 = vmatpush1.bf16.msra.mxu0 %v946_v7  ;;  %841 = vmatmul.mubr.msk.bf16.vlgmr.msra.gmra.mxu1 %vm518_vm2, %v955_v18 }
  0x3a   : > { %537 = vmatprep.subr.bf16.mxu0 %v948_v10 }
  0x3c   : > { %829 = vmatmul.mubr.msk.bf16.gmra.mxu0 %vm401_vm1, %v954_v19 }
  0x3d   : > { %538 = vmatpush1.bf16.msra.mxu0 %v950_v12  ;;  %557 = vmatprep.mubr.bf16.mxu0 %v1067_v0 }
  0x3e   : > { %539 = vmatprep.subr.bf16.mxu0 %v951_v13 }
  0x41   : > { %540 = vmatpush1.bf16.msra.mxu0 %v953_v15 }
  0x44   : > { %840 = vmatmul.mubr.msk.bf16.vlgmr.msra.gmra.mxu0 %vm518_vm2, %v943_v21 }
  0xa5   : > { %v595_v26 = vpop.permute.xlu1 %594 }
  0xa8   : > { %v585_v46 = vpop.permute.xlu0 %584 }
  0xa9   : > { %v600_v36 = vpop.permute.xlu1 %599 }
  0xae   : > { %v590_v59 = vpop.permute.xlu0 %589 }
  0xf4   : > { %v449_v22 = vpop.f32.mrf.mxu0 }
  0xf6   : > { %v451_v23 = vpop.f32.mrf.mxu0 }
  0xf8   : > { %v453_v24 = vpop.f32.mrf.mxu0 }
  0xf9   : > { %v569_v27 = vpop.f32.mrf.mxu1 }
  0xfa   : > { %v455_v25 = vpop.f32.mrf.mxu0 }
  0xfb   : > { %v571_v30 = vpop.f32.mrf.mxu1 }
  0xfc   : > { %v459_v28 = vpop.f32.mrf.mxu0 }
  0xfd   : > { %v570_v29 = vadd.f32 %v569_v27, %v459_v28  ;;  %v573_v34 = vpop.f32.mrf.mxu1 }
  0xfe   : > { %v461_v31 = vpop.f32.mrf.mxu0 }
  0xff   : > { %v606_v32 = vadd.f32 %v595_v26, %v570_v29  ;;  %v572_v33 = vadd.f32 %v571_v30, %v461_v31  ;;  %v575_v39 = vpop.f32.mrf.mxu1 }
 0x100   : > { %v463_v35 = vpop.f32.mrf.mxu0 }
 0x101   : > { %v607_v37 = vadd.f32 %v595_v26, %v572_v33  ;;  %v574_v38 = vadd.f32 %v573_v34, %v463_v35  ;;  %v614_v41 = vmax.f32 %v606_v32, 0.0 }
 0x102   : > { %v465_v40 = vpop.f32.mrf.mxu0 }
 0x103   : > { %v615_v42 = vmax.f32 %v607_v37, 0.0  ;;  %v608_v43 = vadd.f32 %v600_v36, %v574_v38  ;;  %v576_v44 = vadd.f32 %v575_v39, %v465_v40 }
 0x104   : > { %v559_v45 = vpop.f32.mrf.mxu0 }
 0x105   : > { %v855_v47 = vpack.c.bf16 %v615_v42, %v614_v41  ;;  %v560_v48 = vadd.f32 %v559_v45, %v449_v22  ;;  %v609_v49 = vadd.f32 %v600_v36, %v576_v44  ;;  %v616_v51 = vmax.f32 %v608_v43, 0.0 }
 0x106   : > { %v561_v50 = vpop.f32.mrf.mxu0 }
 0x107   : > { %644 = vst [vmem:[%s332_s8 + $0x10] sm:$0xff] %v855_v47  ;;  %v617_v52 = vmax.f32 %v609_v49, 0.0  ;;  %v602_v53 = vadd.f32 %v585_v46, %v560_v48  ;;  %v562_v54 = vadd.f32 %v561_v50, %v451_v23 }
 0x108   : > { %v563_v55 = vpop.f32.mrf.mxu0 }
 0x109   : > { %v856_v56 = vpack.c.bf16 %v617_v52, %v616_v51  ;;  %v603_v57 = vadd.f32 %v585_v46, %v562_v54  ;;  %v564_v58 = vadd.f32 %v563_v55, %v453_v24  ;;  %v610_v61 = vmax.f32 %v602_v53, 0.0 }
 0x10a   : > { %v565_v60 = vpop.f32.mrf.mxu0 }
 0x10b   : > { %645 = vst [vmem:[%s332_s8 + $0x18] sm:$0xff] %v856_v56  ;;  %v611_v62 = vmax.f32 %v603_v57, 0.0  ;;  %v604_v63 = vadd.f32 %v590_v59, %v564_v58  ;;  %v566_v0 = vadd.f32 %v565_v60, %v455_v25 }
 0x10d   : > { %v853_v1 = vpack.c.bf16 %v611_v62, %v610_v61  ;;  %v605_v2 = vadd.f32 %v590_v59, %v566_v0  ;;  %v612_v3 = vmax.f32 %v604_v63, 0.0 }
 0x10f   : > { %642 = vst [vmem:[%s332_s8] sm:$0xff] %v853_v1  ;;  %v613_v4 = vmax.f32 %v605_v2, 0.0 }
 0x111   : > { %v854_v5 = vpack.c.bf16 %v613_v4, %v612_v3 }
 0x113   : > { %643 = vst [vmem:[%s332_s8 + $0x8] sm:$0xff] %v854_v5 }
 0x114   : > { %995 = shalt.err (!%p992_p3)
}
 0x115   : > { %s996_s25 = scalar_lea.hbm %s1218_s14, 512  ;;  %s1000_s7 = scalar_lea.hbm %s1272_s5, 1024 }
 0x116   : > { %p997_p5 = scmp.ne.s32.totalorder %s1218_s14, %s996_s25  ;;  %p1001_p9 = scmp.lt.s32.totalorder %s1218_s14, %s1272_s5 }
 0x117   : > { %p1002_p12 = scmp.lt.s32.totalorder %s1000_s7, %s996_s25 }
 0x118   : > { %p998_p6 = pnand %p997_p5, %p1141_p4 }
 0x119   : > { %p1003_p10 = por %p1002_p12, %p1001_p9 }
 0x11a   : > { %p999_p7 = pneg %p998_p6 }
 0x11c   : > { %p1004_p11 = pnand %p1003_p10, %p999_p7 }
 0x11e   : > { %1007 = shalt.err (!%p1004_p11)
}
 0x11f   : > { %s1069_s11 = smov 128   ;;  %s1070_s12 = smov 8  }
 0x120   : > { %870 = dma.vmem_to_hbm [thread:$0]  (%p1141_p4), %s1213_s10, 512, %s1218_s14, %s1222_s15, %s1069_s11, %s1069_s11, %s1070_s12  }
 0x121 PF: > { %p882_p13 = scmp.ge.s32.totalorder %s1062_s23, 2  ;;  %s680_s13 = sand.u32 1, %s1042_s18  }
 0x122   : > { %s681_s16 = scalar_lea.sflag [#allocation4], %s680_s13 }
 0x123   : > { %p877_p0 = pnand %p882_p13, %p1148_p8 }
 0x125   : > { %p878_p1 = pneg %p877_p0 }
 0x127   : > { %1037 = dma.done.wait (%p878_p1), %s681_s16, 512  }
 0x128   : > { %1039 = vsyncadd (%p878_p1), %s681_s16, 4294966784  ;;  %s19_s23 = sadd.s32 1, %s1062_s23   ;;  %s1277_s18 = smov %s1046_s19 }
 0x129   : > { %p16_p2 = scmp.ge.s32.totalorder %s19_s23, 4   ;;  %s1278_s19 = smov %s1050_s20 }
 0x12a   : > { %s1279_s20 = smov %s1154_s6  ;;  %s1280_s21 = smov %s1058_s22 }
 0x12b   : > { %s1281_s22 = smov %s1283_s26  ;;  %18 = sbr.rel (!%p16_p2) target bundleno = 5 (0x5), region = 90 }
 0x130   :  { %686 = vsyncpa [#allocation3], 1 }
 0x131   :  { %688 = vsyncpa [#allocation3 + $0x1], 1 }
 0x132   :  { %689 = vsyncpa [#allocation4], 1 }
 0x133   :  { %691 = vsyncpa [#allocation4 + $0x1], 1 }

</bundles_post_ra>
